<compile_context>
chip_gen: v7x
topology: tpu7x:2x2x1
jax: 0.10.0
libtpu: 0.0.40
codegen_flags: <defaults>
</compile_context>

<pallas_src>
import functools
import math

import numpy as np
import jax
import jax.numpy as jnp
from jax.experimental import pallas as pl
from jax.experimental.pallas import tpu as pltpu

_VMEM = pltpu.MemorySpace.VMEM
_VMEM_LIMIT = 32 * 1024 * 1024


def _round_up(x, m):
    return ((x + m - 1) // m) * m


def _cdiv(a, b):
    return (a + b - 1) // b


# ------------------------------ Pallas kernels -------------------------------

def _dense_layer_kernel(x_ref, s1_ref, t1_ref, w1_ref, s2_ref, t2_ref, w2_ref,
                        o_ref, acc_ref, zbuf_ref, *, h, w, kc):
    """Fused DenseNet layer: BN->ReLU->Conv1x1(->128)->BN->ReLU->Conv3x3(->32, padded to 128)."""
    k = pl.program_id(1)

    @pl.when(k == 0)
    def _init():
        acc_ref[...] = jnp.zeros_like(acc_ref)

    a = x_ref[...].astype(jnp.float32) * s1_ref[...] + t1_ref[...]
    a = jnp.maximum(a, 0.0).astype(jnp.bfloat16)
    acc_ref[...] += jnp.dot(a, w1_ref[...], preferred_element_type=jnp.float32)

    @pl.when(k == kc - 1)
    def _finalize():
        # BN2 + ReLU of the 128-wide bottleneck, scattered into a zero-padded (h+2, w+2) plane.
        zbuf_ref[...] = jnp.zeros_like(zbuf_ref)
        s2 = s2_ref[...]
        t2 = t2_ref[...]
        for r in range(h):
            zr = jnp.maximum(acc_ref[r * w:(r + 1) * w, :] * s2 + t2, 0.0)
            zbuf_ref[r + 1, 1:w + 1, :] = zr.astype(jnp.bfloat16)
        # 9-tap 3x3 convolution (stride 1, pad 1), row by row, f32 accumulation on the MXU.
        for r in range(h):
            row = None
            for di in range(3):
                for dj in range(3):
                    win = zbuf_ref[r + di, dj:dj + w, :]                     # (w, 128)
                    tap = w2_ref[(di * 3 + dj) * 128:(di * 3 + dj + 1) * 128, :]
                    d = jnp.dot(win, tap, preferred_element_type=jnp.float32)
                    row = d if row is None else row + d
            o_ref[r * w:(r + 1) * w, :] = row.astype(o_ref.dtype)


def _transition_kernel(x_ref, s_ref, t_ref, w_ref, o_ref, acc_ref, *, kc):
    """Fused transition conv: BN -> ReLU -> Conv1x1 (C -> C/2)."""
    k = pl.program_id(1)

    @pl.when(k == 0)
    def _init():
        acc_ref[...] = jnp.zeros_like(acc_ref)

    a = x_ref[...].astype(jnp.float32) * s_ref[...] + t_ref[...]
    a = jnp.maximum(a, 0.0).astype(jnp.bfloat16)
    acc_ref[...] += jnp.dot(a, w_ref[...], preferred_element_type=jnp.float32)

    @pl.when(k == kc - 1)
    def _finalize():
        o_ref[...] = acc_ref[...].astype(o_ref.dtype)


def _avgpool_embed_kernel(x_ref, o_ref, *, co):
    """AvgPool2d(2, 2); result embedded into the next block's zero-initialized feature buffer."""
    x = x_ref[...].astype(jnp.float32)            # (Hh, 2, Wh, 2*co)
    r = x[:, 0] + x[:, 1]                          # (Hh, Wh, 2*co)
    p = (r[..., :co] + r[..., co:]) * 0.25         # (Hh, Wh, co)
    o_ref[:, :, :co] = p.astype(o_ref.dtype)
    o_ref[:, :, co:] = jnp.zeros(
        (o_ref.shape[0], o_ref.shape[1], o_ref.shape[2] - co), o_ref.dtype)


def _stem_maxpool_kernel(x_ref, o_ref, *, hp, wp):
    """MaxPool2d(3, stride=2, padding=1) on post-ReLU (>=0) data; zero padding is valid."""
    x = x_ref[...]                                 # (Hh, 2, Wh, 256): even/odd padded rows & cols
    r0 = x[:, 0]                                   # even padded rows   (Hh, Wh, 256)
    r1 = x[:, 1]                                   # odd padded rows
    vm = jnp.maximum(jnp.maximum(r0[:hp], r1[:hp]), r0[1:hp + 1])       # (hp, Wh, 256)
    ce = vm[..., :128]                             # even padded cols
    codd = vm[..., 128:]                           # odd padded cols
    out = jnp.maximum(jnp.maximum(ce[:, :wp], codd[:, :wp]), ce[:, 1:wp + 1])
    o_ref[:, :, :128] = out
    o_ref[:, :, 128:] = jnp.zeros(
        (o_ref.shape[0], o_ref.shape[1], o_ref.shape[2] - 128), o_ref.dtype)


def _stem_conv_kernel(a_ref, w_ref, s_ref, t_ref, o_ref):
    """im2col GEMM + folded BN + ReLU for the 7x7 stem convolution."""
    y = jnp.dot(a_ref[...], w_ref[...], preferred_element_type=jnp.float32)
    y = jnp.maximum(y * s_ref[...] + t_ref[...], 0.0)
    o_ref[...] = y.astype(o_ref.dtype)


def _classifier_kernel(fct_ref, fmri_ref, sct_ref, tct_ref, smri_ref, tmri_ref,
                       w1c_ref, w1m_ref, b1_ref, w2_ref, b2_ref, o_ref):
    """norm5 (affine) + AdaptiveAvgPool2d((1,1)) + Linear(3840,512) + ReLU + Linear(512,nc)."""
    # The norm5 affine commutes with the spatial mean, so apply it to the pooled features.
    pc = jnp.mean(fct_ref[...].astype(jnp.float32), axis=1) * sct_ref[...] + tct_ref[...]
    pm = jnp.mean(fmri_ref[...].astype(jnp.float32), axis=1) * smri_ref[...] + tmri_ref[...]
    hid = (jnp.dot(pc.astype(jnp.bfloat16), w1c_ref[...], preferred_element_type=jnp.float32)
           + jnp.dot(pm.astype(jnp.bfloat16), w1m_ref[...], preferred_element_type=jnp.float32)
           + b1_ref[...])
    hid = jnp.maximum(hid, 0.0)
    # Dropout(0.3) is identity in eval mode.
    o_ref[...] = (jnp.dot(hid.astype(jnp.bfloat16), w2_ref[...],
                          preferred_element_type=jnp.float32) + b2_ref[...])


# ------------------------------ jitted wrappers -------------------------------

@functools.partial(jax.jit, static_argnames=("h", "w", "kc"), donate_argnums=(0,))
def dense_layer_pallas(feat, c_off, s1, t1, w1, s2, t2, w2, *, h, w, kc):
    """One DenseNet layer; the 32 new channels are written into `feat` at channel offset c_off."""
    B, HW, _ = feat.shape
    flops = 2 * B * HW * (kc * 128) * 128 + 2 * B * HW * 1152 * 128
    bytes_accessed = (B * HW * kc * 128 + w1.size + w2.size + B * HW * 128) * 2
    delta = pl.pallas_call(
        functools.partial(_dense_layer_kernel, h=h, w=w, kc=kc),
        out_shape=jax.ShapeDtypeStruct((B, HW, 128), jnp.bfloat16),
        grid_spec=pltpu.PrefetchScalarGridSpec(
            num_scalar_prefetch=0,
            grid=(B, kc),
            in_specs=[
                pl.BlockSpec((None, HW, 128), lambda b, k: (b, 0, k)),
                pl.BlockSpec((None, 1, 128), lambda b, k: (k, 0, 0)),
                pl.BlockSpec((None, 1, 128), lambda b, k: (k, 0, 0)),
                pl.BlockSpec((128, 128), lambda b, k: (k, 0)),
                pl.BlockSpec((1, 128), lambda b, k: (0, 0)),
                pl.BlockSpec((1, 128), lambda b, k: (0, 0)),
                pl.BlockSpec((1152, 128), lambda b, k: (0, 0)),
            ],
            out_specs=pl.BlockSpec((None, HW, 128), lambda b, k: (b, 0, 0)),
            scratch_shapes=[
                pltpu.VMEM((HW, 128), jnp.float32),
                pltpu.VMEM((h + 2, w + 2, 128), jnp.bfloat16),
            ],
        ),
        compiler_params=pltpu.CompilerParams(
            dimension_semantics=("parallel", "arbitrary"),
            vmem_limit_bytes=_VMEM_LIMIT),
        cost_estimate=pl.CostEstimate(flops=flops, transcendentals=0,
                                      bytes_accessed=bytes_accessed),
    )(feat, s1, t1, w1, s2, t2, w2)
    # Merge the 32 real channels into the (donated) persistent feature buffer.
    return jax.lax.dynamic_update_slice(feat, delta[:, :, :32], (0, 0, c_off))


@functools.partial(jax.jit, static_argnames=("kc",))
def transition_conv_pallas(feat, s, t, w, *, kc):
    B, HW, _ = feat.shape
    Co = w.shape[1]
    return pl.pallas_call(
        functools.partial(_transition_kernel, kc=kc),
        out_shape=jax.ShapeDtypeStruct((B, HW, Co), jnp.bfloat16),
        grid_spec=pltpu.PrefetchScalarGridSpec(
            num_scalar_prefetch=0,
            grid=(B, kc),
            in_specs=[
                pl.BlockSpec((None, HW, 128), lambda b, k: (b, 0, k)),
                pl.BlockSpec((None, 1, 128), lambda b, k: (k, 0, 0)),
                pl.BlockSpec((None, 1, 128), lambda b, k: (k, 0, 0)),
                pl.BlockSpec((128, Co), lambda b, k: (k, 0)),
            ],
            out_specs=pl.BlockSpec((None, HW, Co), lambda b, k: (b, 0, 0)),
            scratch_shapes=[pltpu.VMEM((HW, Co), jnp.float32)],
        ),
        compiler_params=pltpu.CompilerParams(
            dimension_semantics=("parallel", "arbitrary"),
            vmem_limit_bytes=_VMEM_LIMIT),
    )(feat, s, t, w)


@functools.partial(jax.jit, static_argnames=("h", "w", "co", "cb_next"))
def avgpool_embed_pallas(x, *, h, w, co, cb_next):
    """AvgPool2d(2,2) of the (B, h*w, co) transition output, embedded into a fresh
    zero-initialized (B, (h//2)*(w//2), cb_next) dense-block feature buffer."""
    B = x.shape[0]
    hh, wh = h // 2, w // 2
    xr = x.reshape(B, hh, 2, wh, 2 * co)
    out = pl.pallas_call(
        functools.partial(_avgpool_embed_kernel, co=co),
        out_shape=jax.ShapeDtypeStruct((B, hh, wh, cb_next), jnp.bfloat16),
        grid_spec=pltpu.PrefetchScalarGridSpec(
            num_scalar_prefetch=0,
            grid=(B,),
            in_specs=[pl.BlockSpec((None, hh, 2, wh, 2 * co), lambda b: (b, 0, 0, 0, 0))],
            out_specs=pl.BlockSpec((None, hh, wh, cb_next), lambda b: (b, 0, 0, 0)),
        ),
        compiler_params=pltpu.CompilerParams(
            dimension_semantics=("parallel",), vmem_limit_bytes=_VMEM_LIMIT),
    )(xr)
    return out.reshape(B, hh * wh, cb_next)


@functools.partial(jax.jit, static_argnames=("cb",))
def stem_maxpool_pallas(a, *, cb):
    """MaxPool2d(3, 2, 1) of the stem activation; emits the block-0 feature buffer (width cb)."""
    B, Ho, Wo, C = a.shape                         # C == 128 (64 real + 64 zero-padded)
    hp, wp = Ho // 2, Wo // 2
    xp = jnp.pad(a, ((0, 0), (1, 1), (1, 1), (0, 0)))
    xr = xp.reshape(B, (Ho + 2) // 2, 2, (Wo + 2) // 2, 2 * C)
    out = pl.pallas_call(
        functools.partial(_stem_maxpool_kernel, hp=hp, wp=wp),
        out_shape=jax.ShapeDtypeStruct((B, hp, wp, cb), jnp.bfloat16),
        grid_spec=pltpu.PrefetchScalarGridSpec(
            num_scalar_prefetch=0,
            grid=(B,),
            in_specs=[pl.BlockSpec((None, (Ho + 2) // 2, 2, (Wo + 2) // 2, 2 * C),
                                   lambda b: (b, 0, 0, 0, 0))],
            out_specs=pl.BlockSpec((None, hp, wp, cb), lambda b: (b, 0, 0, 0)),
        ),
        compiler_params=pltpu.CompilerParams(
            dimension_semantics=("parallel",), vmem_limit_bytes=_VMEM_LIMIT),
    )(xr)
    return out.reshape(B, hp * wp, cb)


@functools.partial(jax.jit, static_argnames=("kh", "kw", "stride", "pad"))
def stem_conv_bn_relu_pallas(x, w, s, t, *, kh, kw, stride, pad):
    """Conv2d(3->64, k7, s2, p3) + BN + ReLU; M-tiled Pallas GEMM (output padded to 128 lanes)."""
    B, H, W, Cin = x.shape
    Ho = (H + 2 * pad - kh) // stride + 1
    Wo = (W + 2 * pad - kw) // stride + 1
    xp = jnp.pad(x, ((0, 0), (pad, pad), (pad, pad), (0, 0)))
    cols = [xp[:, di:di + stride * Ho:stride, dj:dj + stride * Wo:stride, :]
            for di in range(kh) for dj in range(kw)]
    patches = jnp.concatenate(cols, axis=-1).reshape(B * Ho * Wo, kh * kw * Cin)
    Kp = w.shape[0]
    M = B * Ho * Wo
    tile_m = 512 if M >= 512 else _round_up(M, 16)
    Mp = _round_up(M, tile_m)
    a = jnp.pad(patches, ((0, Mp - M), (0, Kp - kh * kw * Cin))).astype(jnp.bfloat16)
    out = pl.pallas_call(
        _stem_conv_kernel,
        out_shape=jax.ShapeDtypeStruct((Mp, 128), jnp.bfloat16),
        grid_spec=pltpu.PrefetchScalarGridSpec(
            num_scalar_prefetch=0,
            grid=(Mp // tile_m,),
            in_specs=[
                pl.BlockSpec((tile_m, Kp), lambda i: (i, 0)),
                pl.BlockSpec((Kp, 128), lambda i: (0, 0)),
                pl.BlockSpec((1, 128), lambda i: (0, 0)),
                pl.BlockSpec((1, 128), lambda i: (0, 0)),
            ],
            out_specs=pl.BlockSpec((tile_m, 128), lambda i: (i, 0)),
        ),
        compiler_params=pltpu.CompilerParams(
            dimension_semantics=("parallel",), vmem_limit_bytes=_VMEM_LIMIT),
    )(a, w, s, t)
    return out[:M].reshape(B, Ho, Wo, 128)


@jax.jit
def classifier_pallas(f_ct, f_mri, s5c, t5c, s5m, t5m, w1c, w1m, b1, w2, b2):
    B = f_ct.shape[0]
    return pl.pallas_call(
        _classifier_kernel,
        out_shape=jax.ShapeDtypeStruct((B, w2.shape[1]), jnp.float32),
        in_specs=[pl.BlockSpec(memory_space=_VMEM)] * 11,
        out_specs=pl.BlockSpec(memory_space=_VMEM),
        compiler_params=pltpu.CompilerParams(vmem_limit_bytes=_VMEM_LIMIT),
    )(f_ct, f_mri, s5c, t5c, s5m, t5m, w1c, w1m, b1, w2, b2)


# ------------------------------ parameter init (deterministic, synthetic) -----

_GROWTH = 32
_BN_SIZE = 4
_BLOCK_CONFIG = (6, 12, 48, 32)
_INIT_FEATURES = 64
_EPS = 1e-5

_rng = np.random.default_rng(0)


def _bf16(a):
    return jnp.asarray(a, dtype=jnp.bfloat16)


def _f32(a):
    return jnp.asarray(a, dtype=jnp.float32)


def _he(fan_in, shape):
    return _rng.normal(0.0, math.sqrt(2.0 / fan_in), size=shape).astype(np.float32)


def _bn_fold(c):
    # Fresh torchvision init (eval mode): gamma=1, beta=0, running_mean=0, running_var=1.
    gamma = np.ones(c, np.float32)
    beta = np.zeros(c, np.float32)
    mean = np.zeros(c, np.float32)
    var = np.ones(c, np.float32)
    scale = gamma / np.sqrt(var + _EPS)
    shift = beta - mean * scale
    return scale.astype(np.float32), shift.astype(np.float32)


def _pad_chunked(vec, kp):
    out = np.zeros(kp, np.float32)
    out[:vec.shape[0]] = vec
    return out.reshape(kp // 128, 1, 128)


def make_densenet201_features_params():
    p = {}
    # stem: conv0 (7x7, 3->64) + norm0 (folded), K padded 147->256, Cout padded 64->128.
    w0 = _he(7 * 7 * 3, (7, 7, 3, _INIT_FEATURES)).reshape(7 * 7 * 3, _INIT_FEATURES)
    w0p = np.zeros((256, 128), np.float32)
    w0p[:7 * 7 * 3, :_INIT_FEATURES] = w0
    s0, t0 = _bn_fold(_INIT_FEATURES)
    s0p = np.zeros((1, 128), np.float32); s0p[0, :_INIT_FEATURES] = s0
    t0p = np.zeros((1, 128), np.float32); t0p[0, :_INIT_FEATURES] = t0
    p["conv0_w"] = _bf16(w0p)
    p["norm0_s"] = _f32(s0p)
    p["norm0_t"] = _f32(t0p)

    blocks, trans = [], []
    c = _INIT_FEATURES
    for bi, n_layers in enumerate(_BLOCK_CONFIG):
        bucket = c + n_layers * _GROWTH
        layers = []
        for i in range(n_layers):
            in_ch = c + i * _GROWTH
            kc = _cdiv(in_ch, 128)
            kp = kc * 128
            s1, t1 = _bn_fold(in_ch)
            w1 = _he(in_ch, (in_ch, _BN_SIZE * _GROWTH))                 # (in_ch, 128)
            w1p = np.zeros((kp, 128), np.float32); w1p[:in_ch] = w1
            s2, t2 = _bn_fold(_BN_SIZE * _GROWTH)
            w2 = _he(9 * 128, (3, 3, 128, _GROWTH)).reshape(9 * 128, _GROWTH)
            w2p = np.zeros((9 * 128, 128), np.float32); w2p[:, :_GROWTH] = w2
            layers.append(dict(
                c_in=in_ch, kc=kc,
                s1=_f32(_pad_chunked(s1, kp)), t1=_f32(_pad_chunked(t1, kp)),
                w1=_bf16(w1p),
                s2=_f32(s2.reshape(1, 128)), t2=_f32(t2.reshape(1, 128)),
                w2=_bf16(w2p)))
        blocks.append(dict(layers=layers, bucket=bucket, c_in=c))
        c = bucket
        if bi < 3:
            st, tt = _bn_fold(c)
            wt = _he(c, (c, c // 2))
            trans.append(dict(
                kc=c // 128,
                s=_f32(st.reshape(c // 128, 1, 128)),
                t=_f32(tt.reshape(c // 128, 1, 128)),
                w=_bf16(wt)))
            c = c // 2
    p["blocks"] = blocks
    p["trans"] = trans
    s5, t5 = _bn_fold(c)   # c == 1920
    p["norm5_s"] = _f32(s5.reshape(1, c))
    p["norm5_t"] = _f32(t5.reshape(1, c))
    return p


def make_classifier_params(num_classes=2):
    in1, out1 = 3840, 512
    b1b = 1.0 / math.sqrt(in1)
    b2b = 1.0 / math.sqrt(out1)
    w1 = _rng.uniform(-b1b, b1b, (in1, out1)).astype(np.float32)
    b1 = _rng.uniform(-b1b, b1b, (out1,)).astype(np.float32)
    w2 = _rng.uniform(-b2b, b2b, (out1, num_classes)).astype(np.float32)
    b2 = _rng.uniform(-b2b, b2b, (num_classes,)).astype(np.float32)
    ncp = _round_up(num_classes, 128)
    w2p = np.zeros((out1, ncp), np.float32); w2p[:, :num_classes] = w2
    b2p = np.zeros((1, ncp), np.float32); b2p[0, :num_classes] = b2
    return dict(w1_ct=_bf16(w1[:1920]), w1_mri=_bf16(w1[1920:]),
                b1=_f32(b1.reshape(1, out1)), w2=_bf16(w2p), b2=_f32(b2p))


# ------------------------------ model forward ---------------------------------

def densenet201_features(x_nhwc, p):
    """Flat (B, Hf*Wf, 1920) bf16 feature map; norm5's affine is applied in the classifier."""
    a = stem_conv_bn_relu_pallas(x_nhwc, p["conv0_w"], p["norm0_s"], p["norm0_t"],
                                 kh=7, kw=7, stride=2, pad=3)
    _, H, W, _ = a.shape
    feat = stem_maxpool_pallas(a, cb=p["blocks"][0]["bucket"])
    H, W = H // 2, W // 2
    for bi in range(4):
        blk = p["blocks"][bi]
        for lp in blk["layers"]:
            feat = dense_layer_pallas(feat, lp["c_in"], lp["s1"], lp["t1"], lp["w1"],
                                      lp["s2"], lp["t2"], lp["w2"],
                                      h=H, w=W, kc=lp["kc"])
        if bi < 3:
            t = p["trans"][bi]
            y = transition_conv_pallas(feat, t["s"], t["t"], t["w"], kc=t["kc"])
            feat = avgpool_embed_pallas(y, h=H, w=W, co=t["w"].shape[1],
                                        cb_next=p["blocks"][bi + 1]["bucket"])
            H, W = H // 2, W // 2
    return feat


def multimodal_densenet_forward(x_ct_nchw, x_mri_nchw, params, num_classes=2):
    # layout: NCHW (PyTorch) -> NHWC (channels on the TPU lane dim).
    x_ct = jnp.transpose(x_ct_nchw, (0, 2, 3, 1)).astype(jnp.float32)
    x_mri = jnp.transpose(x_mri_nchw, (0, 2, 3, 1)).astype(jnp.float32)
    f_ct = densenet201_features(x_ct, params["ct"])
    f_mri = densenet201_features(x_mri, params["mri"])
    cls = params["cls"]
    logits = classifier_pallas(f_ct, f_mri,
                               params["ct"]["norm5_s"], params["ct"]["norm5_t"],
                               params["mri"]["norm5_s"], params["mri"]["norm5_t"],
                               cls["w1_ct"], cls["w1_mri"], cls["b1"], cls["w2"], cls["b2"])
    return logits[:, :num_classes]


# ------------------------------ main -------------------------------------------

if __name__ == "__main__":
    NUM_CLASSES = 2
    params = {
        "ct": make_densenet201_features_params(),
        "mri": make_densenet201_features_params(),
        "cls": make_classifier_params(NUM_CLASSES),
    }

    key = jax.random.PRNGKey(0)
    k_ct, k_mri = jax.random.split(key)
    # Small DenseNet-compatible inputs: (B=2, C=3, H=W=64) NCHW.
    x_ct = jax.random.normal(k_ct, (2, 3, 64, 64), dtype=jnp.float32)
    x_mri = jax.random.normal(k_mri, (2, 3, 64, 64), dtype=jnp.float32)

    logits = multimodal_densenet_forward(x_ct, x_mri, params, num_classes=NUM_CLASSES)
    logits = jax.block_until_ready(logits)
    assert logits.shape == (2, NUM_CLASSES), logits.shape
    print("KERNEL_OK")
</pallas_src>

<mosaic_0001>
module attributes {stable_mosaic.version = 11 : i64} {
  func.func @_stem_conv_kernel(%arg0: i32, %arg1: memref<512x256xbf16, #tpu.memory_space<vmem>>, %arg2: memref<256x128xbf16, #tpu.memory_space<vmem>>, %arg3: memref<1x128xf32, #tpu.memory_space<vmem>>, %arg4: memref<1x128xf32, #tpu.memory_space<vmem>>, %arg5: memref<512x128xbf16, #tpu.memory_space<vmem>>) attributes {dimension_semantics = [#tpu.dimension_semantics<parallel>], iteration_bounds = array<i64: 4>, scalar_prefetch = 0 : i64, scratch_operands = 0 : i64, tpu.core_type = #tpu.core_type<tc>, window_params = [{transform_indices = @transform_0, window_bounds = array<i64: 512, 256>}, {pipeline_mode = #tpu.pipeline_mode<synchronous>, transform_indices = @transform_1, window_bounds = array<i64: 256, 128>}, {pipeline_mode = #tpu.pipeline_mode<synchronous>, transform_indices = @transform_2, window_bounds = array<i64: 1, 128>}, {pipeline_mode = #tpu.pipeline_mode<synchronous>, transform_indices = @transform_3, window_bounds = array<i64: 1, 128>}, {transform_indices = @transform_4, window_bounds = array<i64: 512, 128>}]} {
    %c0 = arith.constant 0 : index
    %c0_0 = arith.constant 0 : index
    %0 = vector.load %arg1[%c0, %c0_0] : memref<512x256xbf16, #tpu.memory_space<vmem>>, vector<512x256xbf16>
    %c0_1 = arith.constant 0 : index
    %c0_2 = arith.constant 0 : index
    %1 = vector.load %arg2[%c0_1, %c0_2] : memref<256x128xbf16, #tpu.memory_space<vmem>>, vector<256x128xbf16>
    %cst = arith.constant dense<0.000000e+00> : vector<512x128xf32>
    %2 = tpu.matmul %0, %1, %cst {dimension_numbers = #tpu.dot_dimension_numbers<[1], [0], [0], [1], [0, 0, 1, 1], [], []>} : vector<512x256xbf16>, vector<256x128xbf16>, vector<512x128xf32> -> vector<512x128xf32>
    %c0_3 = arith.constant 0 : index
    %c0_4 = arith.constant 0 : index
    %3 = vector.load %arg3[%c0_3, %c0_4] : memref<1x128xf32, #tpu.memory_space<vmem>>, vector<1x128xf32>
    %4 = vector.broadcast %3 : vector<1x128xf32> to vector<512x128xf32>
    %5 = arith.mulf %2, %4 : vector<512x128xf32>
    %c0_5 = arith.constant 0 : index
    %c0_6 = arith.constant 0 : index
    %6 = vector.load %arg4[%c0_5, %c0_6] : memref<1x128xf32, #tpu.memory_space<vmem>>, vector<1x128xf32>
    %7 = vector.broadcast %6 : vector<1x128xf32> to vector<512x128xf32>
    %8 = arith.addf %5, %7 : vector<512x128xf32>
    %cst_7 = arith.constant 0.000000e+00 : f32
    %9 = vector.broadcast %cst_7 : f32 to vector<512x128xf32>
    %10 = arith.maximumf %8, %9 : vector<512x128xf32>
    %11 = arith.truncf %10 : vector<512x128xf32> to vector<512x128xbf16>
    %c0_8 = arith.constant 0 : index
    %c0_9 = arith.constant 0 : index
    %12 = vector.load %arg5[%c0_8, %c0_9] : memref<512x128xbf16, #tpu.memory_space<vmem>>, vector<512x128xbf16>
    tpu.vector_store %arg5[%c0_8, %c0_9], %11 {strides = array<i32>} : memref<512x128xbf16, #tpu.memory_space<vmem>>, vector<512x128xbf16>,
    return
  }
  func.func @transform_0(%arg0: i32) -> (i32, i32) {
    %c0_i32 = arith.constant 0 : i32
    %c0_i32_0 = arith.constant 0 : i32
    return %arg0, %c0_i32 : i32, i32
  }
  func.func @transform_1(%arg0: i32) -> (i32, i32) {
    %c0_i32 = arith.constant 0 : i32
    %c0_i32_0 = arith.constant 0 : i32
    %c0_i32_1 = arith.constant 0 : i32
    return %c0_i32, %c0_i32_0 : i32, i32
  }
  func.func @transform_2(%arg0: i32) -> (i32, i32) {
    %c0_i32 = arith.constant 0 : i32
    %c0_i32_0 = arith.constant 0 : i32
    %c0_i32_1 = arith.constant 0 : i32
    return %c0_i32, %c0_i32_0 : i32, i32
  }
  func.func @transform_3(%arg0: i32) -> (i32, i32) {
    %c0_i32 = arith.constant 0 : i32
    %c0_i32_0 = arith.constant 0 : i32
    %c0_i32_1 = arith.constant 0 : i32
    return %c0_i32, %c0_i32_0 : i32, i32
  }
  func.func @transform_4(%arg0: i32) -> (i32, i32) {
    %c0_i32 = arith.constant 0 : i32
    %c0_i32_0 = arith.constant 0 : i32
    return %arg0, %c0_i32 : i32, i32
  }
}

</mosaic_0001>

<bundles_post_ra>
// kernel: stem_conv_bn_relu_pallas.1
= control target key start
LH: loop header
LB: loop body
LE: loop exit
PB: predicated region body
PF: predicated region fallthrough
CT: control target
= control target key end

     0   :  { %9 = vsyncpa [#allocation3], 0  ;;  %s2726_s0 = inlined_call_operand.vmem [shape: bf16[2048,256], index: 0, kind: input, shape index: {}]   ;;  %s2727_s1 = inlined_call_operand.vmem [shape: bf16[256,128], index: 1, kind: input, shape index: {}]   ;;  %s2728_s2 = inlined_call_operand.vmem [shape: f32[1,128], index: 2, kind: input, shape index: {}]   ;;  %s2729_s3 = inlined_call_operand.vmem [shape: f32[1,128], index: 3, kind: input, shape index: {}]   ;;  %s2730_s4 = inlined_call_operand.hbm [shape: bf16[2048,128], index: 4, kind: output, shape index: {}]  }
   0x1   :  { %11 = vsyncpa [#allocation3 + $0x1], 0  ;;  %s2301_s15 = smov 0   ;;  %s2303_s16 = smov 0  }
   0x2   :  { %s2305_s17 = smov 0   ;;  %s2307_s18 = smov 0  }
   0x3 LB: > { %s2322_s19 = sadd.s32 4294967295, %s2270_s18   ;;  %s1606_s20 = sadd.s32 4294967294, %s2270_s18   ;;  %s2270_s18 = sphi %s2307_s18, %s2736_s18   ;;  %s2266_s17 = sphi %s2305_s17, %s2735_s17   ;;  %s2262_s16 = sphi %s2303_s16, %s2734_s16   ;;  %s2258_s15 = sphi %s2301_s15, %s2733_s15  }
   0x4   : > { %s2326_s21 = sadd.s32 1, %s2270_s18   ;;  %s113_s22 = sadd.s32 1, %s2266_s17 }
   0x5   : > { %s110_s23 = ssub.s32 %s2270_s18, %s2326_s21  ;;  %p123_p0 = scmp.ne.s32.totalorder %s2266_s17, %s2262_s16 }
   0x6   : > { %p111_p1 = scmp.eq.s32.totalorder %s110_s23, 0  ;;  %p124_p2 = scmp.eq.s32.totalorder %s2322_s19, 3 }
   0x7   : > { %p129_p3 = scmp.ne.s32.totalorder %s2262_s16, %s2258_s15  ;;  %p130_p4 = scmp.eq.s32.totalorder %s1606_s20, 3 }
   0x8   : > { %s2337_s24 = scalar_select %p111_p1, %s2266_s17, %s113_s22  }
   0x9   : > { %p2339_p5 = por %p124_p2, %p123_p0  ;;  %p2343_p6 = por %p130_p4, %p129_p3 }
   0xa   : > { %p1609_p7 = scmp.ge.s32.totalorder %s2270_s18, 1  ;;  %p167_p8 = scmp.lt.s32.totalorder %s2270_s18, 5 }
   0xc   : > { %p168_p9 = pnand %p1609_p7, %p167_p8 }
   0xd   : > { %v2096_v0 = vld [vmem:[%s2727_s1] sm:$0xff] (!%p168_p9)   ;;  %v2272_v1 = vmov (!%p168_p9), 0   ;;  %s1611_s29 = sshll.u32 (!%p168_p9), %s2322_s19, 6  ;;  %v2097_v2 = vld [vmem:[%s2727_s1 + $0x8] sm:$0xff] (!%p168_p9)   ;;  %v2098_v3 = vld [vmem:[%s2727_s1 + $0x10] sm:$0xff] (!%p168_p9)   ;;  %s1830_s11 = sshll.u32 (!%p168_p9), %s2322_s19, 12 }
   0xe   : > { %171 = sbr.rel (%p168_p9) target bundleno = 436 (0x1b4), region = 36  ;;  %715 = vmatprep.subr.bf16.mxu0 (!%p168_p9), %v2272_v1  ;;  %2022 = vmatprep.subr.bf16.mxu1 (!%p168_p9), %v2272_v1  ;;  %p195_p10 = scmp.lt.s32.totalorder (!%p168_p9), %s1611_s29, 255  ;;  %v2099_v4 = vld [vmem:[%s2727_s1 + $0x18] sm:$0xff] (!%p168_p9)   ;;  %v2100_v5 = vld [vmem:[%s2727_s1 + $0x20] sm:$0xff] (!%p168_p9)   ;;  %v2101_v7 = vld [vmem:[%s2727_s1 + $0x28] sm:$0xff] (!%p168_p9)  }
   0xf   : > { %716 = vmatpush1.bf16.msra.mxu0 (!%p168_p9), %v2096_v0  ;;  %2038 = vmatpush1.bf16.msra.mxu1 (!%p168_p9), %v2096_v0  ;;  %v2102_v9 = vld [vmem:[%s2727_s1 + $0x30] sm:$0xff] (!%p168_p9)   ;;  %v2103_v10 = vld [vmem:[%s2727_s1 + $0x38] sm:$0xff] (!%p168_p9)   ;;  %v2104_v11 = vld [vmem:[%s2727_s1 + $0x40] sm:$0xff] (!%p168_p9)   ;;  %s2677_s22 = scalar_lea.hbm (!%p168_p9), %s2730_s4, %s1830_s11  ;;  %s2273_s27 = smov (!%p168_p9), [#allocation2]  }
  0x10   : > { %717 = vmatprep.subr.bf16.mxu0 (!%p168_p9), %v2272_v1  ;;  %2023 = vmatprep.subr.bf16.mxu1 (!%p168_p9), %v2272_v1  ;;  %v2105_v12 = vld [vmem:[%s2727_s1 + $0x48] sm:$0xff] (!%p168_p9)   ;;  %v2106_v13 = vld [vmem:[%s2727_s1 + $0x50] sm:$0xff] (!%p168_p9)   ;;  %v2107_v14 = vld [vmem:[%s2727_s1 + $0x58] sm:$0xff] (!%p168_p9)   ;;  %s2212_s28 = sshll.u32 (!%p168_p9), %s2273_s27, 4  ;;  %s2213_s28 = int_to_ptr.vmem [resolvable:$false] %s2212_s28 }
  0x11   : > { %v2108_v15 = vld [vmem:[%s2727_s1 + $0x60] sm:$0xff] (!%p168_p9)   ;;  %v2109_v16 = vld [vmem:[%s2727_s1 + $0x68] sm:$0xff] (!%p168_p9)   ;;  %v2110_v17 = vld [vmem:[%s2727_s1 + $0x70] sm:$0xff] (!%p168_p9)  }
  0x12   : > { %v2111_v18 = vld [vmem:[%s2727_s1 + $0x78] sm:$0xff] (!%p168_p9)  }
  0x13   : > { %718 = vmatpush1.bf16.msra.mxu0 (!%p168_p9), %v2097_v2  ;;  %2039 = vmatpush1.bf16.msra.mxu1 (!%p168_p9), %v2097_v2 }
  0x14   : > { %719 = vmatprep.subr.bf16.mxu0 (!%p168_p9), %v2272_v1  ;;  %2024 = vmatprep.subr.bf16.mxu1 (!%p168_p9), %v2272_v1 }
  0x15   : > { %s2738_s29 = smov (!%p195_p10, %s1611_s29), 255 }
  0x16   : > { %s1765_s10 = sshll.u32 %s2738_s29, 3  ;;  %s2214_s29 = scalar_lea.vmem %s2213_s28, 8192 }
  0x17   : > { %720 = vmatpush1.bf16.msra.mxu0 %v2098_v3  ;;  %2040 = vmatpush1.bf16.msra.mxu1 %v2098_v3  ;;  %s2376_s20 = scalar_lea.vmem %s2726_s0, %s1765_s10 }
  0x18   : > { %721 = vmatprep.subr.bf16.mxu0 %v2272_v1  ;;  %2025 = vmatprep.subr.bf16.mxu1 %v2272_v1  ;;  %v2114_v6 = vld [vmem:[%s2376_s20 + $0x4] ss:$8 sps:$4 sm:$0xff]   ;;  %v2112_v19 = vld [vmem:[%s2376_s20] ss:$8 sps:$4 sm:$0xff]   ;;  %v2118_v21 = vld [vmem:[%s2376_s20 + $0x14] ss:$8 sps:$4 sm:$0xff]  }
  0x19   : > { %v2117_v8 = vld [vmem:[%s2376_s20 + $0x104] ss:$8 sps:$4 sm:$0xff]   ;;  %747 = vmatprep.mubr.bf16.mxu0 %v2114_v6  ;;  %v2115_v20 = vld [vmem:[%s2376_s20 + $0x100] ss:$8 sps:$4 sm:$0xff]   ;;  %v2120_v22 = vld [vmem:[%s2376_s20 + $0x114] ss:$8 sps:$4 sm:$0xff]  }
  0x1a   : > { %875 = vmatprep.mubr.bf16.mxu1 %v2117_v8  ;;  %v2122_v23 = vld [vmem:[%s2376_s20 + $0x10] ss:$8 sps:$4 sm:$0xff]   ;;  %v2124_v25 = vld [vmem:[%s2376_s20 + $0x24] ss:$8 sps:$4 sm:$0xff]   ;;  %v2128_v27 = vld [vmem:[%s2376_s20 + $0x20] ss:$8 sps:$4 sm:$0xff]  }
  0x1b   : > { %722 = vmatpush1.bf16.msra.mxu0 %v2099_v4  ;;  %2041 = vmatpush1.bf16.msra.mxu1 %v2099_v4  ;;  %v2123_v24 = vld [vmem:[%s2376_s20 + $0x110] ss:$8 sps:$4 sm:$0xff]   ;;  %v2126_v26 = vld [vmem:[%s2376_s20 + $0x124] ss:$8 sps:$4 sm:$0xff]   ;;  %v2129_v28 = vld [vmem:[%s2376_s20 + $0x120] ss:$8 sps:$4 sm:$0xff]  }
  0x1c   : > { %723 = vmatprep.subr.bf16.mxu0 %v2272_v1  ;;  %2026 = vmatprep.subr.bf16.mxu1 %v2272_v1  ;;  %v2130_v29 = vld [vmem:[%s2376_s20 + $0x34] ss:$8 sps:$4 sm:$0xff]   ;;  %v2134_v31 = vld [vmem:[%s2376_s20 + $0x30] ss:$8 sps:$4 sm:$0xff]   ;;  %v2136_v33 = vld [vmem:[%s2376_s20 + $0x44] ss:$8 sps:$4 sm:$0xff]  }
  0x1d   : > { %v2132_v30 = vld [vmem:[%s2376_s20 + $0x134] ss:$8 sps:$4 sm:$0xff]   ;;  %v2135_v32 = vld [vmem:[%s2376_s20 + $0x130] ss:$8 sps:$4 sm:$0xff]   ;;  %v2138_v34 = vld [vmem:[%s2376_s20 + $0x144] ss:$8 sps:$4 sm:$0xff]  }
  0x1e   : > { %v2140_v35 = vld [vmem:[%s2376_s20 + $0x40] ss:$8 sps:$4 sm:$0xff]   ;;  %v2142_v37 = vld [vmem:[%s2376_s20 + $0x54] ss:$8 sps:$4 sm:$0xff]   ;;  %v2146_v39 = vld [vmem:[%s2376_s20 + $0x50] ss:$8 sps:$4 sm:$0xff]  }
  0x1f   : > { %724 = vmatpush1.bf16.msra.mxu0 %v2100_v5  ;;  %2042 = vmatpush1.bf16.msra.mxu1 %v2100_v5  ;;  %v2141_v36 = vld [vmem:[%s2376_s20 + $0x140] ss:$8 sps:$4 sm:$0xff]   ;;  %v2144_v38 = vld [vmem:[%s2376_s20 + $0x154] ss:$8 sps:$4 sm:$0xff]   ;;  %v2147_v40 = vld [vmem:[%s2376_s20 + $0x150] ss:$8 sps:$4 sm:$0xff]  }
  0x20   : > { %725 = vmatprep.subr.bf16.mxu0 %v2272_v1  ;;  %2027 = vmatprep.subr.bf16.mxu1 %v2272_v1  ;;  %v2148_v41 = vld [vmem:[%s2376_s20 + $0x64] ss:$8 sps:$4 sm:$0xff]   ;;  %v2152_v43 = vld [vmem:[%s2376_s20 + $0x60] ss:$8 sps:$4 sm:$0xff]   ;;  %v2154_v45 = vld [vmem:[%s2376_s20 + $0x74] ss:$8 sps:$4 sm:$0xff]  }
  0x21   : > { %v2150_v42 = vld [vmem:[%s2376_s20 + $0x164] ss:$8 sps:$4 sm:$0xff]   ;;  %v2153_v44 = vld [vmem:[%s2376_s20 + $0x160] ss:$8 sps:$4 sm:$0xff]   ;;  %v2156_v46 = vld [vmem:[%s2376_s20 + $0x174] ss:$8 sps:$4 sm:$0xff]  }
  0x22   : > { %v2158_v47 = vld [vmem:[%s2376_s20 + $0x70] ss:$8 sps:$4 sm:$0xff]   ;;  %v2160_v49 = vld [vmem:[%s2376_s20 + $0x84] ss:$8 sps:$4 sm:$0xff]   ;;  %v2164_v51 = vld [vmem:[%s2376_s20 + $0x80] ss:$8 sps:$4 sm:$0xff]  }
  0x23   : > { %726 = vmatpush1.bf16.msra.mxu0 %v2101_v7  ;;  %2043 = vmatpush1.bf16.msra.mxu1 %v2101_v7  ;;  %v2159_v48 = vld [vmem:[%s2376_s20 + $0x170] ss:$8 sps:$4 sm:$0xff]   ;;  %v2162_v50 = vld [vmem:[%s2376_s20 + $0x184] ss:$8 sps:$4 sm:$0xff]   ;;  %v2165_v52 = vld [vmem:[%s2376_s20 + $0x180] ss:$8 sps:$4 sm:$0xff]  }
  0x24   : > { %727 = vmatprep.subr.bf16.mxu0 %v2272_v1  ;;  %2028 = vmatprep.subr.bf16.mxu1 %v2272_v1  ;;  %v2166_v53 = vld [vmem:[%s2376_s20 + $0x94] ss:$8 sps:$4 sm:$0xff]   ;;  %v2170_v55 = vld [vmem:[%s2376_s20 + $0x90] ss:$8 sps:$4 sm:$0xff]   ;;  %v2172_v57 = vld [vmem:[%s2376_s20 + $0xa4] ss:$8 sps:$4 sm:$0xff]  }
  0x25   : > { %v2168_v54 = vld [vmem:[%s2376_s20 + $0x194] ss:$8 sps:$4 sm:$0xff]   ;;  %v2171_v56 = vld [vmem:[%s2376_s20 + $0x190] ss:$8 sps:$4 sm:$0xff]   ;;  %v2174_v58 = vld [vmem:[%s2376_s20 + $0x1a4] ss:$8 sps:$4 sm:$0xff]  }
  0x26   : > { %v2176_v59 = vld [vmem:[%s2376_s20 + $0xa0] ss:$8 sps:$4 sm:$0xff]   ;;  %v2178_v61 = vld [vmem:[%s2376_s20 + $0xb4] ss:$8 sps:$4 sm:$0xff]   ;;  %v2182_v63 = vld [vmem:[%s2376_s20 + $0xb0] ss:$8 sps:$4 sm:$0xff]  }
  0x27   : > { %728 = vmatpush1.bf16.msra.mxu0 %v2102_v9  ;;  %2044 = vmatpush1.bf16.msra.mxu1 %v2102_v9  ;;  %v2177_v60 = vld [vmem:[%s2376_s20 + $0x1a0] ss:$8 sps:$4 sm:$0xff]   ;;  %v2180_v62 = vld [vmem:[%s2376_s20 + $0x1b4] ss:$8 sps:$4 sm:$0xff]   ;;  %v2183_v0 = vld [vmem:[%s2376_s20 + $0x1b0] ss:$8 sps:$4 sm:$0xff]  }
  0x28   : > { %729 = vmatprep.subr.bf16.mxu0 %v2272_v1  ;;  %2029 = vmatprep.subr.bf16.mxu1 %v2272_v1  ;;  %v2186_v2 = vld [vmem:[%s2376_s20 + $0x1c4] ss:$8 sps:$4 sm:$0xff]   ;;  %v2188_v3 = vld [vmem:[%s2376_s20 + $0xc0] ss:$8 sps:$4 sm:$0xff]   ;;  %v2190_v5 = vld [vmem:[%s2376_s20 + $0xd4] ss:$8 sps:$4 sm:$0xff]  }
  0x29   : > { %v2189_v4 = vld [vmem:[%s2376_s20 + $0x1c0] ss:$8 sps:$4 sm:$0xff]   ;;  %v2192_v6 = vld [vmem:[%s2376_s20 + $0x1d4] ss:$8 sps:$4 sm:$0xff]   ;;  %v2194_v7 = vld [vmem:[%s2376_s20 + $0xd0] ss:$8 sps:$4 sm:$0xff]  }
  0x2a   : > { %v2195_v8 = vld [vmem:[%s2376_s20 + $0x1d0] ss:$8 sps:$4 sm:$0xff]   ;;  %v2196_v9 = vld [vmem:[%s2376_s20 + $0xe4] ss:$8 sps:$4 sm:$0xff]  }
  0x2b   : > { %730 = vmatpush1.bf16.msra.mxu0 %v2103_v10  ;;  %2045 = vmatpush1.bf16.msra.mxu1 %v2103_v10  ;;  %v2198_v10 = vld [vmem:[%s2376_s20 + $0x1e4] ss:$8 sps:$4 sm:$0xff]  }
  0x2c   : > { %731 = vmatprep.subr.bf16.mxu0 %v2272_v1  ;;  %2030 = vmatprep.subr.bf16.mxu1 %v2272_v1 }
  0x2f   : > { %732 = vmatpush1.bf16.msra.mxu0 %v2104_v11  ;;  %2046 = vmatpush1.bf16.msra.mxu1 %v2104_v11  ;;  %v2200_v11 = vld [vmem:[%s2376_s20 + $0xe0] ss:$8 sps:$4 sm:$0xff]  }
  0x30   : > { %733 = vmatprep.subr.bf16.mxu0 %v2272_v1  ;;  %2031 = vmatprep.subr.bf16.mxu1 %v2272_v1 }
  0x33   : > { %734 = vmatpush1.bf16.msra.mxu0 %v2105_v12  ;;  %2047 = vmatpush1.bf16.msra.mxu1 %v2105_v12  ;;  %v2201_v12 = vld [vmem:[%s2376_s20 + $0x1e0] ss:$8 sps:$4 sm:$0xff]  }
  0x34   : > { %735 = vmatprep.subr.bf16.mxu0 %v2272_v1  ;;  %2032 = vmatprep.subr.bf16.mxu1 %v2272_v1 }
  0x37   : > { %736 = vmatpush1.bf16.msra.mxu0 %v2106_v13  ;;  %2048 = vmatpush1.bf16.msra.mxu1 %v2106_v13  ;;  %v2202_v13 = vld [vmem:[%s2376_s20 + $0xf4] ss:$8 sps:$4 sm:$0xff]  }
  0x38   : > { %737 = vmatprep.subr.bf16.mxu0 %v2272_v1  ;;  %2033 = vmatprep.subr.bf16.mxu1 %v2272_v1 }
  0x3b   : > { %738 = vmatpush1.bf16.msra.mxu0 %v2107_v14  ;;  %2049 = vmatpush1.bf16.msra.mxu1 %v2107_v14  ;;  %v2204_v14 = vld [vmem:[%s2376_s20 + $0x1f4] ss:$8 sps:$4 sm:$0xff]  }
  0x3c   : > { %739 = vmatprep.subr.bf16.mxu0 %v2272_v1  ;;  %2034 = vmatprep.subr.bf16.mxu1 %v2272_v1 }
  0x3f   : > { %740 = vmatpush1.bf16.msra.mxu0 %v2108_v15  ;;  %2050 = vmatpush1.bf16.msra.mxu1 %v2108_v15  ;;  %v2206_v15 = vld [vmem:[%s2376_s20 + $0xf0] ss:$8 sps:$4 sm:$0xff]  }
  0x40   : > { %741 = vmatprep.subr.bf16.mxu0 %v2272_v1  ;;  %2035 = vmatprep.subr.bf16.mxu1 %v2272_v1 }
  0x43   : > { %742 = vmatpush1.bf16.msra.mxu0 %v2109_v16  ;;  %2051 = vmatpush1.bf16.msra.mxu1 %v2109_v16  ;;  %v2207_v16 = vld [vmem:[%s2376_s20 + $0x1f0] ss:$8 sps:$4 sm:$0xff]  }
  0x44   : > { %743 = vmatprep.subr.bf16.mxu0 %v2272_v1  ;;  %2036 = vmatprep.subr.bf16.mxu1 %v2272_v1 }
  0x47   : > { %744 = vmatpush1.bf16.msra.mxu0 %v2110_v17  ;;  %2052 = vmatpush1.bf16.msra.mxu1 %v2110_v17  ;;  %v2502_v17 = vld [vmem:[%s2728_s2] ss:$0 sm:$0xff] }
  0x48   : > { %745 = vmatprep.subr.bf16.mxu0 %v2272_v1  ;;  %2037 = vmatprep.subr.bf16.mxu1 %v2272_v1  ;;  %v2184_v1 = vld [vmem:[%s2376_s20 + $0xc4] ss:$8 sps:$4 sm:$0xff]   ;;  %s191_s20 = sand.u32 1, %s2262_s16  }
  0x49   : > { %s1610_s9 = sshll.u32 %s191_s20, 8  ;;  %s2685_s19 = scalar_lea.sflag [#allocation3], %s191_s20 }
  0x4a   : > { %s2522_s10 = scalar_lea.vmem [#allocation2], %s1610_s9 }
  0x4b   : > { %746 = vmatpush1.bf16.msra.mxu0 %v2111_v18  ;;  %2053 = vmatpush1.bf16.msra.mxu1 %v2111_v18  ;;  %s1544_s12 = sshll.u32 %s2522_s10, 4  ;;  %s2679_s12 = int_to_ptr.vmem [resolvable:$true] %s1544_s12 }
  0x4c   : > { %s2208_s23 = scalar_lea.vmem %s2679_s12, 4096  ;;  %p2215_p0 = scmp.lt.s32.totalorder %s2679_s12, %s2213_s28 }
  0x4d   : > { %p2209_p11 = scmp.ne.s32.totalorder %s2679_s12, %s2208_s23  ;;  %p2216_p1 = scmp.lt.s32.totalorder %s2214_s29, %s2208_s23 }
  0x4e   : > { %748 = vmatmul.mubr.bf16.vlgmr.msra.gmra.mrb[0].mxu0 %v2112_v19  ;;  %876 = vmatmul.mubr.bf16.vlgmr.msra.gmra.mrb[0].mxu1 %v2115_v20  ;;  %v2507_v19 = vld [vmem:[%s2729_s3] ss:$0 sm:$0xff] }
  0x4f   : > { %755 = vmatprep.mubr.bf16.mxu0 %v2118_v21  ;;  %883 = vmatprep.mubr.bf16.mxu1 %v2120_v22  ;;  %p2210_p12 = pnand %p2209_p11, %p2339_p5  ;;  %p2217_p2 = por %p2216_p1, %p2215_p0 }
  0x51   : > { %p2211_p13 = pneg %p2210_p12 }
  0x53   : > { %p2218_p3 = pnand %p2217_p2, %p2211_p13 }
  0x56   : > { %756 = vmatmul.mubr.bf16.gmra.mrb[4].mxu0 %v2122_v23  ;;  %884 = vmatmul.mubr.bf16.gmra.mrb[4].mxu1 %v2123_v24 }
  0x57   : > { %763 = vmatprep.mubr.bf16.mxu0 %v2124_v25  ;;  %891 = vmatprep.mubr.bf16.mxu1 %v2126_v26 }
  0x5e   : > { %764 = vmatmul.mubr.bf16.gmra.mrb[8].mxu0 %v2128_v27  ;;  %892 = vmatmul.mubr.bf16.gmra.mrb[8].mxu1 %v2129_v28 }
  0x5f   : > { %771 = vmatprep.mubr.bf16.mxu0 %v2130_v29  ;;  %899 = vmatprep.mubr.bf16.mxu1 %v2132_v30 }
  0x66   : > { %772 = vmatmul.mubr.bf16.gmra.mrb[12].mxu0 %v2134_v31  ;;  %900 = vmatmul.mubr.bf16.gmra.mrb[12].mxu1 %v2135_v32 }
  0x67   : > { %779 = vmatprep.mubr.bf16.mxu0 %v2136_v33  ;;  %907 = vmatprep.mubr.bf16.mxu1 %v2138_v34 }
  0x6e   : > { %780 = vmatmul.mubr.bf16.gmra.mrb[16].mxu0 %v2140_v35  ;;  %908 = vmatmul.mubr.bf16.gmra.mrb[16].mxu1 %v2141_v36 }
  0x6f   : > { %787 = vmatprep.mubr.bf16.mxu0 %v2142_v37  ;;  %915 = vmatprep.mubr.bf16.mxu1 %v2144_v38 }
  0x76   : > { %788 = vmatmul.mubr.bf16.gmra.mrb[20].mxu0 %v2146_v39  ;;  %916 = vmatmul.mubr.bf16.gmra.mrb[20].mxu1 %v2147_v40 }
  0x77   : > { %795 = vmatprep.mubr.bf16.mxu0 %v2148_v41  ;;  %923 = vmatprep.mubr.bf16.mxu1 %v2150_v42 }
  0x7e   : > { %796 = vmatmul.mubr.bf16.gmra.mrb[24].mxu0 %v2152_v43  ;;  %924 = vmatmul.mubr.bf16.gmra.mrb[24].mxu1 %v2153_v44 }
  0x7f   : > { %803 = vmatprep.mubr.bf16.mxu0 %v2154_v45  ;;  %931 = vmatprep.mubr.bf16.mxu1 %v2156_v46 }
  0x86   : > { %804 = vmatmul.mubr.bf16.gmra.mrb[28].mxu0 %v2158_v47  ;;  %932 = vmatmul.mubr.bf16.gmra.mrb[28].mxu1 %v2159_v48 }
  0x87   : > { %811 = vmatprep.mubr.bf16.mxu0 %v2160_v49  ;;  %939 = vmatprep.mubr.bf16.mxu1 %v2162_v50 }
  0x8e   : > { %812 = vmatmul.mubr.bf16.gmra.mrb[32].mxu0 %v2164_v51  ;;  %940 = vmatmul.mubr.bf16.gmra.mrb[32].mxu1 %v2165_v52 }
  0x8f   : > { %819 = vmatprep.mubr.bf16.mxu0 %v2166_v53  ;;  %947 = vmatprep.mubr.bf16.mxu1 %v2168_v54 }
  0x96   : > { %820 = vmatmul.mubr.bf16.gmra.mrb[36].mxu0 %v2170_v55  ;;  %948 = vmatmul.mubr.bf16.gmra.mrb[36].mxu1 %v2171_v56 }
  0x97   : > { %827 = vmatprep.mubr.bf16.mxu0 %v2172_v57  ;;  %955 = vmatprep.mubr.bf16.mxu1 %v2174_v58 }
  0x9e   : > { %828 = vmatmul.mubr.bf16.gmra.mrb[40].mxu0 %v2176_v59  ;;  %956 = vmatmul.mubr.bf16.gmra.mrb[40].mxu1 %v2177_v60 }
  0x9f   : > { %835 = vmatprep.mubr.bf16.mxu0 %v2178_v61  ;;  %963 = vmatprep.mubr.bf16.mxu1 %v2180_v62 }
  0xa6   : > { %836 = vmatmul.mubr.bf16.gmra.mrb[44].mxu0 %v2182_v63  ;;  %964 = vmatmul.mubr.bf16.gmra.mrb[44].mxu1 %v2183_v0 }
  0xa7   : > { %843 = vmatprep.mubr.bf16.mxu0 %v2184_v1  ;;  %971 = vmatprep.mubr.bf16.mxu1 %v2186_v2 }
  0xae   : > { %844 = vmatmul.mubr.bf16.gmra.mrb[48].mxu0 %v2188_v3  ;;  %972 = vmatmul.mubr.bf16.gmra.mrb[48].mxu1 %v2189_v4 }
  0xaf   : > { %851 = vmatprep.mubr.bf16.mxu0 %v2190_v5  ;;  %979 = vmatprep.mubr.bf16.mxu1 %v2192_v6 }
  0xb6   : > { %852 = vmatmul.mubr.bf16.gmra.mrb[52].mxu0 %v2194_v7  ;;  %980 = vmatmul.mubr.bf16.gmra.mrb[52].mxu1 %v2195_v8 }
  0xb7   : > { %859 = vmatprep.mubr.bf16.mxu0 %v2196_v9  ;;  %987 = vmatprep.mubr.bf16.mxu1 %v2198_v10 }
  0xbe   : > { %860 = vmatmul.mubr.bf16.gmra.mrb[56].mxu0 %v2200_v11  ;;  %988 = vmatmul.mubr.bf16.gmra.mrb[56].mxu1 %v2201_v12 }
  0xbf   : > { %867 = vmatprep.mubr.bf16.mxu0 %v2202_v13  ;;  %995 = vmatprep.mubr.bf16.mxu1 %v2204_v14 }
  0xc6   : > { %868 = vmatmul.mubr.bf16.gmra.mrb[60].mxu0 %v2206_v15  ;;  %996 = vmatmul.mubr.bf16.gmra.mrb[60].mxu1 %v2207_v16 }
 0x121   : > { %v749_v18 = vpop.f32.mrb[0].mxu0  ;;  %v877_v20 = vpop.f32.mrb[0].mxu1 }
 0x122   : > { %v1011_v21 = vmul.f32 %v2502_v17, %v749_v18  ;;  %v1043_v22 = vmul.f32 %v2502_v17, %v877_v20  ;;  %v751_v23 = vpop.f32.mrb[1].mxu0  ;;  %v879_v24 = vpop.f32.mrb[1].mxu1 }
 0x123   : > { %v752_v25 = vpop.f32.mrb[2].mxu0  ;;  %v880_v26 = vpop.f32.mrb[2].mxu1 }
 0x124   : > { %v1082_v27 = vadd.f32 %v2507_v19, %v1011_v21  ;;  %v1114_v28 = vadd.f32 %v2507_v19, %v1043_v22  ;;  %v1012_v29 = vmul.f32 %v2502_v17, %v752_v25  ;;  %v1044_v30 = vmul.f32 %v2502_v17, %v880_v26  ;;  %v754_v31 = vpop.f32.mrb[3].mxu0  ;;  %v882_v32 = vpop.f32.mrb[3].mxu1 }
 0x126   : > { %v1083_v33 = vadd.f32 %v2507_v19, %v1012_v29  ;;  %v1115_v34 = vadd.f32 %v2507_v19, %v1044_v30  ;;  %v1146_v35 = vmax.f32 %v1082_v27, 0.0  ;;  %v1178_v36 = vmax.f32 %v1114_v28, 0.0 }
 0x128   : > { %v1147_v37 = vmax.f32 %v1083_v33, 0.0  ;;  %v1179_v38 = vmax.f32 %v1115_v34, 0.0 }
 0x129   : > { %v757_v39 = vpop.f32.mrb[4].mxu0  ;;  %v885_v40 = vpop.f32.mrb[4].mxu1 }
 0x12a   : > { %v1834_v41 = vpack.c.bf16 %v1147_v37, %v1146_v35  ;;  %v1914_v42 = vpack.c.bf16 %v1179_v38, %v1178_v36  ;;  %v1013_v43 = vmul.f32 %v2502_v17, %v757_v39  ;;  %v1045_v44 = vmul.f32 %v2502_v17, %v885_v40  ;;  %v759_v45 = vpop.f32.mrb[5].mxu0  ;;  %v887_v46 = vpop.f32.mrb[5].mxu1 }
 0x12b   : > { %v760_v47 = vpop.f32.mrb[6].mxu0  ;;  %v888_v48 = vpop.f32.mrb[6].mxu1 }
 0x12c   : > { %1835 = vst [vmem:[%s2522_s10] sm:$0xff] %v1834_v41   ;;  %2006 = vst [vmem:[%s2522_s10 + $0x80] sm:$0xff] %v1914_v42   ;;  %v1084_v49 = vadd.f32 %v2507_v19, %v1013_v43  ;;  %v1116_v50 = vadd.f32 %v2507_v19, %v1045_v44  ;;  %v1014_v51 = vmul.f32 %v2502_v17, %v760_v47  ;;  %v762_v53 = vpop.f32.mrb[7].mxu0  ;;  %v890_v54 = vpop.f32.mrb[7].mxu1 }
 0x12d   : > { %v1046_v52 = vmul.f32 %v2502_v17, %v888_v48 }
 0x12e   : > { %v1085_v55 = vadd.f32 %v2507_v19, %v1014_v51  ;;  %v1148_v57 = vmax.f32 %v1084_v49, 0.0  ;;  %v1180_v58 = vmax.f32 %v1116_v50, 0.0 }
 0x12f   : > { %v1117_v56 = vadd.f32 %v2507_v19, %v1046_v52 }
 0x130   : > { %v1149_v59 = vmax.f32 %v1085_v55, 0.0 }
 0x131   : > { %v1181_v60 = vmax.f32 %v1117_v56, 0.0  ;;  %v765_v61 = vpop.f32.mrb[8].mxu0  ;;  %v893_v62 = vpop.f32.mrb[8].mxu1 }
 0x132   : > { %v1839_v63 = vpack.c.bf16 %v1149_v59, %v1148_v57  ;;  %v1015_v1 = vmul.f32 %v2502_v17, %v765_v61  ;;  %v1047_v2 = vmul.f32 %v2502_v17, %v893_v62  ;;  %v767_v3 = vpop.f32.mrb[9].mxu0  ;;  %v895_v4 = vpop.f32.mrb[9].mxu1 }
 0x133   : > { %v1919_v0 = vpack.c.bf16 %v1181_v60, %v1180_v58  ;;  %v768_v5 = vpop.f32.mrb[10].mxu0  ;;  %v896_v6 = vpop.f32.mrb[10].mxu1 }
 0x134   : > { %1991 = vst [vmem:[%s2522_s10 + $0x8] sm:$0xff] %v1839_v63   ;;  %v1086_v7 = vadd.f32 %v2507_v19, %v1015_v1  ;;  %v1118_v8 = vadd.f32 %v2507_v19, %v1047_v2  ;;  %v1016_v9 = vmul.f32 %v2502_v17, %v768_v5  ;;  %v1048_v10 = vmul.f32 %v2502_v17, %v896_v6  ;;  %v770_v11 = vpop.f32.mrb[11].mxu0  ;;  %v898_v12 = vpop.f32.mrb[11].mxu1 }
 0x135   : > { %2007 = vst [vmem:[%s2522_s10 + $0x88] sm:$0xff] %v1919_v0  }
 0x136   : > { %v1087_v13 = vadd.f32 %v2507_v19, %v1016_v9  ;;  %v1119_v14 = vadd.f32 %v2507_v19, %v1048_v10  ;;  %v1150_v15 = vmax.f32 %v1086_v7, 0.0  ;;  %v1182_v16 = vmax.f32 %v1118_v8, 0.0 }
 0x138   : > { %v1151_v18 = vmax.f32 %v1087_v13, 0.0  ;;  %v1183_v20 = vmax.f32 %v1119_v14, 0.0 }
 0x139   : > { %v773_v21 = vpop.f32.mrb[12].mxu0  ;;  %v901_v22 = vpop.f32.mrb[12].mxu1 }
 0x13a   : > { %v1844_v23 = vpack.c.bf16 %v1151_v18, %v1150_v15  ;;  %v1924_v24 = vpack.c.bf16 %v1183_v20, %v1182_v16  ;;  %v1017_v25 = vmul.f32 %v2502_v17, %v773_v21  ;;  %v1049_v26 = vmul.f32 %v2502_v17, %v901_v22  ;;  %v775_v27 = vpop.f32.mrb[13].mxu0  ;;  %v903_v28 = vpop.f32.mrb[13].mxu1 }
 0x13b   : > { %v776_v29 = vpop.f32.mrb[14].mxu0  ;;  %v904_v30 = vpop.f32.mrb[14].mxu1 }
 0x13c   : > { %1992 = vst [vmem:[%s2522_s10 + $0x10] sm:$0xff] %v1844_v23   ;;  %2008 = vst [vmem:[%s2522_s10 + $0x90] sm:$0xff] %v1924_v24   ;;  %v1088_v31 = vadd.f32 %v2507_v19, %v1017_v25  ;;  %v1120_v32 = vadd.f32 %v2507_v19, %v1049_v26  ;;  %v1018_v33 = vmul.f32 %v2502_v17, %v776_v29  ;;  %v778_v35 = vpop.f32.mrb[15].mxu0  ;;  %v906_v36 = vpop.f32.mrb[15].mxu1 }
 0x13d   : > { %v1050_v34 = vmul.f32 %v2502_v17, %v904_v30 }
 0x13e   : > { %v1089_v37 = vadd.f32 %v2507_v19, %v1018_v33  ;;  %v1152_v39 = vmax.f32 %v1088_v31, 0.0  ;;  %v1184_v40 = vmax.f32 %v1120_v32, 0.0 }
 0x13f   : > { %v1121_v38 = vadd.f32 %v2507_v19, %v1050_v34 }
 0x140   : > { %v1153_v41 = vmax.f32 %v1089_v37, 0.0 }
 0x141   : > { %v1185_v42 = vmax.f32 %v1121_v38, 0.0  ;;  %v781_v43 = vpop.f32.mrb[16].mxu0  ;;  %v909_v44 = vpop.f32.mrb[16].mxu1 }
 0x142   : > { %v1849_v45 = vpack.c.bf16 %v1153_v41, %v1152_v39  ;;  %v1019_v47 = vmul.f32 %v2502_v17, %v781_v43  ;;  %v1051_v48 = vmul.f32 %v2502_v17, %v909_v44  ;;  %v783_v49 = vpop.f32.mrb[17].mxu0  ;;  %v911_v50 = vpop.f32.mrb[17].mxu1 }
 0x143   : > { %v1929_v46 = vpack.c.bf16 %v1185_v42, %v1184_v40  ;;  %v784_v51 = vpop.f32.mrb[18].mxu0  ;;  %v912_v52 = vpop.f32.mrb[18].mxu1 }
 0x144   : > { %1993 = vst [vmem:[%s2522_s10 + $0x18] sm:$0xff] %v1849_v45   ;;  %v1090_v53 = vadd.f32 %v2507_v19, %v1019_v47  ;;  %v1122_v54 = vadd.f32 %v2507_v19, %v1051_v48  ;;  %v1020_v55 = vmul.f32 %v2502_v17, %v784_v51  ;;  %v1052_v56 = vmul.f32 %v2502_v17, %v912_v52  ;;  %v786_v57 = vpop.f32.mrb[19].mxu0  ;;  %v914_v58 = vpop.f32.mrb[19].mxu1 }
 0x145   : > { %2009 = vst [vmem:[%s2522_s10 + $0x98] sm:$0xff] %v1929_v46  }
 0x146   : > { %v1091_v59 = vadd.f32 %v2507_v19, %v1020_v55  ;;  %v1123_v60 = vadd.f32 %v2507_v19, %v1052_v56  ;;  %v1154_v61 = vmax.f32 %v1090_v53, 0.0  ;;  %v1186_v62 = vmax.f32 %v1122_v54, 0.0 }
 0x148   : > { %v1155_v63 = vmax.f32 %v1091_v59, 0.0  ;;  %v1187_v0 = vmax.f32 %v1123_v60, 0.0 }
 0x149   : > { %v789_v1 = vpop.f32.mrb[20].mxu0  ;;  %v917_v2 = vpop.f32.mrb[20].mxu1 }
 0x14a   : > { %v1854_v3 = vpack.c.bf16 %v1155_v63, %v1154_v61  ;;  %v1934_v4 = vpack.c.bf16 %v1187_v0, %v1186_v62  ;;  %v1021_v5 = vmul.f32 %v2502_v17, %v789_v1  ;;  %v1053_v6 = vmul.f32 %v2502_v17, %v917_v2  ;;  %v791_v7 = vpop.f32.mrb[21].mxu0  ;;  %v919_v8 = vpop.f32.mrb[21].mxu1 }
 0x14b   : > { %v792_v9 = vpop.f32.mrb[22].mxu0  ;;  %v920_v10 = vpop.f32.mrb[22].mxu1 }
 0x14c   : > { %1994 = vst [vmem:[%s2522_s10 + $0x20] sm:$0xff] %v1854_v3   ;;  %2010 = vst [vmem:[%s2522_s10 + $0xa0] sm:$0xff] %v1934_v4   ;;  %v1092_v11 = vadd.f32 %v2507_v19, %v1021_v5  ;;  %v1124_v12 = vadd.f32 %v2507_v19, %v1053_v6  ;;  %v1022_v13 = vmul.f32 %v2502_v17, %v792_v9  ;;  %v794_v15 = vpop.f32.mrb[23].mxu0  ;;  %v922_v16 = vpop.f32.mrb[23].mxu1 }
 0x14d   : > { %v1054_v14 = vmul.f32 %v2502_v17, %v920_v10 }
 0x14e   : > { %v1093_v18 = vadd.f32 %v2507_v19, %v1022_v13  ;;  %v1156_v21 = vmax.f32 %v1092_v11, 0.0  ;;  %v1188_v22 = vmax.f32 %v1124_v12, 0.0 }
 0x14f   : > { %v1125_v20 = vadd.f32 %v2507_v19, %v1054_v14 }
 0x150   : > { %v1157_v23 = vmax.f32 %v1093_v18, 0.0 }
 0x151   : > { %v1189_v24 = vmax.f32 %v1125_v20, 0.0  ;;  %v797_v25 = vpop.f32.mrb[24].mxu0  ;;  %v925_v26 = vpop.f32.mrb[24].mxu1 }
 0x152   : > { %v1859_v27 = vpack.c.bf16 %v1157_v23, %v1156_v21  ;;  %v1023_v29 = vmul.f32 %v2502_v17, %v797_v25  ;;  %v1055_v30 = vmul.f32 %v2502_v17, %v925_v26  ;;  %v799_v31 = vpop.f32.mrb[25].mxu0  ;;  %v927_v32 = vpop.f32.mrb[25].mxu1 }
 0x153   : > { %v1939_v28 = vpack.c.bf16 %v1189_v24, %v1188_v22  ;;  %v800_v33 = vpop.f32.mrb[26].mxu0  ;;  %v928_v34 = vpop.f32.mrb[26].mxu1 }
 0x154   : > { %1995 = vst [vmem:[%s2522_s10 + $0x28] sm:$0xff] %v1859_v27   ;;  %v1094_v35 = vadd.f32 %v2507_v19, %v1023_v29  ;;  %v1126_v36 = vadd.f32 %v2507_v19, %v1055_v30  ;;  %v1024_v37 = vmul.f32 %v2502_v17, %v800_v33  ;;  %v1056_v38 = vmul.f32 %v2502_v17, %v928_v34  ;;  %v802_v39 = vpop.f32.mrb[27].mxu0  ;;  %v930_v40 = vpop.f32.mrb[27].mxu1 }
 0x155   : > { %2011 = vst [vmem:[%s2522_s10 + $0xa8] sm:$0xff] %v1939_v28  }
 0x156   : > { %v1095_v41 = vadd.f32 %v2507_v19, %v1024_v37  ;;  %v1127_v42 = vadd.f32 %v2507_v19, %v1056_v38  ;;  %v1158_v43 = vmax.f32 %v1094_v35, 0.0  ;;  %v1190_v44 = vmax.f32 %v1126_v36, 0.0 }
 0x158   : > { %v1159_v45 = vmax.f32 %v1095_v41, 0.0  ;;  %v1191_v46 = vmax.f32 %v1127_v42, 0.0 }
 0x159   : > { %v805_v47 = vpop.f32.mrb[28].mxu0  ;;  %v933_v48 = vpop.f32.mrb[28].mxu1 }
 0x15a   : > { %v1864_v49 = vpack.c.bf16 %v1159_v45, %v1158_v43  ;;  %v1944_v50 = vpack.c.bf16 %v1191_v46, %v1190_v44  ;;  %v1025_v51 = vmul.f32 %v2502_v17, %v805_v47  ;;  %v1057_v52 = vmul.f32 %v2502_v17, %v933_v48  ;;  %v807_v53 = vpop.f32.mrb[29].mxu0  ;;  %v935_v54 = vpop.f32.mrb[29].mxu1 }
 0x15b   : > { %v808_v55 = vpop.f32.mrb[30].mxu0  ;;  %v936_v56 = vpop.f32.mrb[30].mxu1 }
 0x15c   : > { %1996 = vst [vmem:[%s2522_s10 + $0x30] sm:$0xff] %v1864_v49   ;;  %2012 = vst [vmem:[%s2522_s10 + $0xb0] sm:$0xff] %v1944_v50   ;;  %v1096_v57 = vadd.f32 %v2507_v19, %v1025_v51  ;;  %v1128_v58 = vadd.f32 %v2507_v19, %v1057_v52  ;;  %v1026_v59 = vmul.f32 %v2502_v17, %v808_v55  ;;  %v810_v61 = vpop.f32.mrb[31].mxu0  ;;  %v938_v62 = vpop.f32.mrb[31].mxu1 }
 0x15d   : > { %v1058_v60 = vmul.f32 %v2502_v17, %v936_v56 }
 0x15e   : > { %v1097_v63 = vadd.f32 %v2507_v19, %v1026_v59  ;;  %v1160_v1 = vmax.f32 %v1096_v57, 0.0  ;;  %v1192_v2 = vmax.f32 %v1128_v58, 0.0 }
 0x15f   : > { %v1129_v0 = vadd.f32 %v2507_v19, %v1058_v60 }
 0x160   : > { %v1161_v3 = vmax.f32 %v1097_v63, 0.0 }
 0x161   : > { %v1193_v4 = vmax.f32 %v1129_v0, 0.0  ;;  %v813_v5 = vpop.f32.mrb[32].mxu0  ;;  %v941_v6 = vpop.f32.mrb[32].mxu1 }
 0x162   : > { %v1869_v7 = vpack.c.bf16 %v1161_v3, %v1160_v1  ;;  %v1027_v9 = vmul.f32 %v2502_v17, %v813_v5  ;;  %v1059_v10 = vmul.f32 %v2502_v17, %v941_v6  ;;  %v815_v11 = vpop.f32.mrb[33].mxu0  ;;  %v943_v12 = vpop.f32.mrb[33].mxu1 }
 0x163   : > { %v1949_v8 = vpack.c.bf16 %v1193_v4, %v1192_v2  ;;  %v816_v13 = vpop.f32.mrb[34].mxu0  ;;  %v944_v14 = vpop.f32.mrb[34].mxu1 }
 0x164   : > { %1997 = vst [vmem:[%s2522_s10 + $0x38] sm:$0xff] %v1869_v7   ;;  %v1098_v15 = vadd.f32 %v2507_v19, %v1027_v9  ;;  %v1130_v16 = vadd.f32 %v2507_v19, %v1059_v10  ;;  %v1028_v18 = vmul.f32 %v2502_v17, %v816_v13  ;;  %v1060_v20 = vmul.f32 %v2502_v17, %v944_v14  ;;  %v818_v21 = vpop.f32.mrb[35].mxu0  ;;  %v946_v22 = vpop.f32.mrb[35].mxu1 }
 0x165   : > { %2013 = vst [vmem:[%s2522_s10 + $0xb8] sm:$0xff] %v1949_v8  }
 0x166   : > { %v1099_v23 = vadd.f32 %v2507_v19, %v1028_v18  ;;  %v1131_v24 = vadd.f32 %v2507_v19, %v1060_v20  ;;  %v1162_v25 = vmax.f32 %v1098_v15, 0.0  ;;  %v1194_v26 = vmax.f32 %v1130_v16, 0.0 }
 0x168   : > { %v1163_v27 = vmax.f32 %v1099_v23, 0.0  ;;  %v1195_v28 = vmax.f32 %v1131_v24, 0.0 }
 0x169   : > { %v821_v29 = vpop.f32.mrb[36].mxu0  ;;  %v949_v30 = vpop.f32.mrb[36].mxu1 }
 0x16a   : > { %v1874_v31 = vpack.c.bf16 %v1163_v27, %v1162_v25  ;;  %v1954_v32 = vpack.c.bf16 %v1195_v28, %v1194_v26  ;;  %v1029_v33 = vmul.f32 %v2502_v17, %v821_v29  ;;  %v1061_v34 = vmul.f32 %v2502_v17, %v949_v30  ;;  %v823_v35 = vpop.f32.mrb[37].mxu0  ;;  %v951_v36 = vpop.f32.mrb[37].mxu1 }
 0x16b   : > { %v824_v37 = vpop.f32.mrb[38].mxu0  ;;  %v952_v38 = vpop.f32.mrb[38].mxu1 }
 0x16c   : > { %1998 = vst [vmem:[%s2522_s10 + $0x40] sm:$0xff] %v1874_v31   ;;  %2014 = vst [vmem:[%s2522_s10 + $0xc0] sm:$0xff] %v1954_v32   ;;  %v1100_v39 = vadd.f32 %v2507_v19, %v1029_v33  ;;  %v1132_v40 = vadd.f32 %v2507_v19, %v1061_v34  ;;  %v1030_v41 = vmul.f32 %v2502_v17, %v824_v37  ;;  %v826_v43 = vpop.f32.mrb[39].mxu0  ;;  %v954_v44 = vpop.f32.mrb[39].mxu1 }
 0x16d   : > { %v1062_v42 = vmul.f32 %v2502_v17, %v952_v38 }
 0x16e   : > { %v1101_v45 = vadd.f32 %v2507_v19, %v1030_v41  ;;  %v1164_v47 = vmax.f32 %v1100_v39, 0.0  ;;  %v1196_v48 = vmax.f32 %v1132_v40, 0.0 }
 0x16f   : > { %v1133_v46 = vadd.f32 %v2507_v19, %v1062_v42 }
 0x170   : > { %v1165_v49 = vmax.f32 %v1101_v45, 0.0 }
 0x171   : > { %v1197_v50 = vmax.f32 %v1133_v46, 0.0  ;;  %v829_v51 = vpop.f32.mrb[40].mxu0  ;;  %v957_v52 = vpop.f32.mrb[40].mxu1 }
 0x172   : > { %v1879_v53 = vpack.c.bf16 %v1165_v49, %v1164_v47  ;;  %v1031_v55 = vmul.f32 %v2502_v17, %v829_v51  ;;  %v1063_v56 = vmul.f32 %v2502_v17, %v957_v52  ;;  %v831_v57 = vpop.f32.mrb[41].mxu0  ;;  %v959_v58 = vpop.f32.mrb[41].mxu1 }
 0x173   : > { %v1959_v54 = vpack.c.bf16 %v1197_v50, %v1196_v48  ;;  %v832_v59 = vpop.f32.mrb[42].mxu0  ;;  %v960_v60 = vpop.f32.mrb[42].mxu1 }
 0x174   : > { %1999 = vst [vmem:[%s2522_s10 + $0x48] sm:$0xff] %v1879_v53   ;;  %v1102_v61 = vadd.f32 %v2507_v19, %v1031_v55  ;;  %v1134_v62 = vadd.f32 %v2507_v19, %v1063_v56  ;;  %v1032_v63 = vmul.f32 %v2502_v17, %v832_v59  ;;  %v1064_v0 = vmul.f32 %v2502_v17, %v960_v60  ;;  %v834_v1 = vpop.f32.mrb[43].mxu0  ;;  %v962_v2 = vpop.f32.mrb[43].mxu1 }
 0x175   : > { %2015 = vst [vmem:[%s2522_s10 + $0xc8] sm:$0xff] %v1959_v54  }
 0x176   : > { %v1103_v3 = vadd.f32 %v2507_v19, %v1032_v63  ;;  %v1135_v4 = vadd.f32 %v2507_v19, %v1064_v0  ;;  %v1166_v5 = vmax.f32 %v1102_v61, 0.0  ;;  %v1198_v6 = vmax.f32 %v1134_v62, 0.0 }
 0x178   : > { %v1167_v7 = vmax.f32 %v1103_v3, 0.0  ;;  %v1199_v8 = vmax.f32 %v1135_v4, 0.0 }
 0x179   : > { %v837_v9 = vpop.f32.mrb[44].mxu0  ;;  %v965_v10 = vpop.f32.mrb[44].mxu1 }
 0x17a   : > { %v1884_v11 = vpack.c.bf16 %v1167_v7, %v1166_v5  ;;  %v1964_v12 = vpack.c.bf16 %v1199_v8, %v1198_v6  ;;  %v1033_v13 = vmul.f32 %v2502_v17, %v837_v9  ;;  %v1065_v14 = vmul.f32 %v2502_v17, %v965_v10  ;;  %v839_v15 = vpop.f32.mrb[45].mxu0  ;;  %v967_v16 = vpop.f32.mrb[45].mxu1 }
 0x17b   : > { %v840_v18 = vpop.f32.mrb[46].mxu0  ;;  %v968_v20 = vpop.f32.mrb[46].mxu1 }
 0x17c   : > { %2000 = vst [vmem:[%s2522_s10 + $0x50] sm:$0xff] %v1884_v11   ;;  %2016 = vst [vmem:[%s2522_s10 + $0xd0] sm:$0xff] %v1964_v12   ;;  %v1104_v21 = vadd.f32 %v2507_v19, %v1033_v13  ;;  %v1136_v22 = vadd.f32 %v2507_v19, %v1065_v14  ;;  %v1034_v23 = vmul.f32 %v2502_v17, %v840_v18  ;;  %v842_v25 = vpop.f32.mrb[47].mxu0  ;;  %v970_v26 = vpop.f32.mrb[47].mxu1 }
 0x17d   : > { %v1066_v24 = vmul.f32 %v2502_v17, %v968_v20 }
 0x17e   : > { %v1105_v27 = vadd.f32 %v2507_v19, %v1034_v23  ;;  %v1168_v29 = vmax.f32 %v1104_v21, 0.0  ;;  %v1200_v30 = vmax.f32 %v1136_v22, 0.0 }
 0x17f   : > { %v1137_v28 = vadd.f32 %v2507_v19, %v1066_v24 }
 0x180   : > { %v1169_v31 = vmax.f32 %v1105_v27, 0.0 }
 0x181   : > { %v1201_v32 = vmax.f32 %v1137_v28, 0.0  ;;  %v845_v33 = vpop.f32.mrb[48].mxu0  ;;  %v973_v34 = vpop.f32.mrb[48].mxu1 }
 0x182   : > { %v1889_v35 = vpack.c.bf16 %v1169_v31, %v1168_v29  ;;  %v1035_v37 = vmul.f32 %v2502_v17, %v845_v33  ;;  %v1067_v38 = vmul.f32 %v2502_v17, %v973_v34  ;;  %v847_v39 = vpop.f32.mrb[49].mxu0  ;;  %v975_v40 = vpop.f32.mrb[49].mxu1 }
 0x183   : > { %v1969_v36 = vpack.c.bf16 %v1201_v32, %v1200_v30  ;;  %v848_v41 = vpop.f32.mrb[50].mxu0  ;;  %v976_v42 = vpop.f32.mrb[50].mxu1 }
 0x184   : > { %2001 = vst [vmem:[%s2522_s10 + $0x58] sm:$0xff] %v1889_v35   ;;  %v1106_v43 = vadd.f32 %v2507_v19, %v1035_v37  ;;  %v1138_v44 = vadd.f32 %v2507_v19, %v1067_v38  ;;  %v1036_v45 = vmul.f32 %v2502_v17, %v848_v41  ;;  %v1068_v46 = vmul.f32 %v2502_v17, %v976_v42  ;;  %v850_v47 = vpop.f32.mrb[51].mxu0  ;;  %v978_v48 = vpop.f32.mrb[51].mxu1 }
 0x185   : > { %2017 = vst [vmem:[%s2522_s10 + $0xd8] sm:$0xff] %v1969_v36  }
 0x186   : > { %v1107_v49 = vadd.f32 %v2507_v19, %v1036_v45  ;;  %v1139_v50 = vadd.f32 %v2507_v19, %v1068_v46  ;;  %v1170_v51 = vmax.f32 %v1106_v43, 0.0  ;;  %v1202_v52 = vmax.f32 %v1138_v44, 0.0 }
 0x188   : > { %v1171_v53 = vmax.f32 %v1107_v49, 0.0  ;;  %v1203_v54 = vmax.f32 %v1139_v50, 0.0 }
 0x189   : > { %v853_v55 = vpop.f32.mrb[52].mxu0  ;;  %v981_v56 = vpop.f32.mrb[52].mxu1 }
 0x18a   : > { %v1894_v57 = vpack.c.bf16 %v1171_v53, %v1170_v51  ;;  %v1974_v58 = vpack.c.bf16 %v1203_v54, %v1202_v52  ;;  %v1037_v59 = vmul.f32 %v2502_v17, %v853_v55  ;;  %v1069_v60 = vmul.f32 %v2502_v17, %v981_v56  ;;  %v855_v61 = vpop.f32.mrb[53].mxu0  ;;  %v983_v62 = vpop.f32.mrb[53].mxu1 }
 0x18b   : > { %v856_v63 = vpop.f32.mrb[54].mxu0  ;;  %v984_v0 = vpop.f32.mrb[54].mxu1 }
 0x18c   : > { %2002 = vst [vmem:[%s2522_s10 + $0x60] sm:$0xff] %v1894_v57   ;;  %2018 = vst [vmem:[%s2522_s10 + $0xe0] sm:$0xff] %v1974_v58   ;;  %v1108_v1 = vadd.f32 %v2507_v19, %v1037_v59  ;;  %v1140_v2 = vadd.f32 %v2507_v19, %v1069_v60  ;;  %v1038_v3 = vmul.f32 %v2502_v17, %v856_v63  ;;  %v858_v5 = vpop.f32.mrb[55].mxu0  ;;  %v986_v6 = vpop.f32.mrb[55].mxu1 }
 0x18d   : > { %v1070_v4 = vmul.f32 %v2502_v17, %v984_v0 }
 0x18e   : > { %v1109_v7 = vadd.f32 %v2507_v19, %v1038_v3  ;;  %v1172_v9 = vmax.f32 %v1108_v1, 0.0  ;;  %v1204_v10 = vmax.f32 %v1140_v2, 0.0 }
 0x18f   : > { %v1141_v8 = vadd.f32 %v2507_v19, %v1070_v4 }
 0x190   : > { %v1173_v11 = vmax.f32 %v1109_v7, 0.0 }
 0x191   : > { %v1205_v12 = vmax.f32 %v1141_v8, 0.0  ;;  %v861_v13 = vpop.f32.mrb[56].mxu0  ;;  %v989_v14 = vpop.f32.mrb[56].mxu1 }
 0x192   : > { %v1899_v15 = vpack.c.bf16 %v1173_v11, %v1172_v9  ;;  %v1039_v18 = vmul.f32 %v2502_v17, %v861_v13  ;;  %v1071_v20 = vmul.f32 %v2502_v17, %v989_v14  ;;  %v863_v21 = vpop.f32.mrb[57].mxu0  ;;  %v991_v22 = vpop.f32.mrb[57].mxu1 }
 0x193   : > { %v1979_v16 = vpack.c.bf16 %v1205_v12, %v1204_v10  ;;  %v864_v23 = vpop.f32.mrb[58].mxu0  ;;  %v992_v24 = vpop.f32.mrb[58].mxu1 }
 0x194   : > { %2003 = vst [vmem:[%s2522_s10 + $0x68] sm:$0xff] %v1899_v15   ;;  %v1110_v25 = vadd.f32 %v2507_v19, %v1039_v18  ;;  %v1142_v26 = vadd.f32 %v2507_v19, %v1071_v20  ;;  %v1040_v27 = vmul.f32 %v2502_v17, %v864_v23  ;;  %v1072_v28 = vmul.f32 %v2502_v17, %v992_v24  ;;  %v866_v29 = vpop.f32.mrb[59].mxu0  ;;  %v994_v30 = vpop.f32.mrb[59].mxu1 }
 0x195   : > { %2019 = vst [vmem:[%s2522_s10 + $0xe8] sm:$0xff] %v1979_v16  }
 0x196   : > { %v1111_v31 = vadd.f32 %v2507_v19, %v1040_v27  ;;  %v1143_v32 = vadd.f32 %v2507_v19, %v1072_v28  ;;  %v1174_v33 = vmax.f32 %v1110_v25, 0.0  ;;  %v1206_v34 = vmax.f32 %v1142_v26, 0.0 }
 0x198   : > { %v1175_v35 = vmax.f32 %v1111_v31, 0.0  ;;  %v1207_v36 = vmax.f32 %v1143_v32, 0.0 }
 0x199   : > { %v869_v37 = vpop.f32.mrb[60].mxu0  ;;  %v997_v38 = vpop.f32.mrb[60].mxu1 }
 0x19a   : > { %v1904_v39 = vpack.c.bf16 %v1175_v35, %v1174_v33  ;;  %v1984_v40 = vpack.c.bf16 %v1207_v36, %v1206_v34  ;;  %v1041_v41 = vmul.f32 %v2502_v17, %v869_v37  ;;  %v1073_v42 = vmul.f32 %v2502_v17, %v997_v38  ;;  %v871_v43 = vpop.f32.mrb[61].mxu0  ;;  %v999_v44 = vpop.f32.mrb[61].mxu1 }
 0x19b   : > { %v872_v45 = vpop.f32.mrb[62].mxu0  ;;  %v1000_v46 = vpop.f32.mrb[62].mxu1 }
 0x19c   : > { %2004 = vst [vmem:[%s2522_s10 + $0x70] sm:$0xff] %v1904_v39   ;;  %2020 = vst [vmem:[%s2522_s10 + $0xf0] sm:$0xff] %v1984_v40   ;;  %v1112_v47 = vadd.f32 %v2507_v19, %v1041_v41  ;;  %v1144_v48 = vadd.f32 %v2507_v19, %v1073_v42  ;;  %v1042_v49 = vmul.f32 %v2502_v17, %v872_v45  ;;  %v874_v51 = vpop.f32.mrb[63].mxu0  ;;  %v1002_v52 = vpop.f32.mrb[63].mxu1 }
 0x19d   : > { %v1074_v50 = vmul.f32 %v2502_v17, %v1000_v46 }
 0x19e   : > { %v1113_v53 = vadd.f32 %v2507_v19, %v1042_v49  ;;  %v1176_v55 = vmax.f32 %v1112_v47, 0.0  ;;  %v1208_v56 = vmax.f32 %v1144_v48, 0.0 }
 0x19f   : > { %v1145_v54 = vadd.f32 %v2507_v19, %v1074_v50 }
 0x1a0   : > { %v1177_v57 = vmax.f32 %v1113_v53, 0.0 }
 0x1a1   : > { %v1209_v58 = vmax.f32 %v1145_v54, 0.0 }
 0x1a2   : > { %v1909_v17 = vpack.c.bf16 %v1177_v57, %v1176_v55 }
 0x1a3   : > { %v1989_v59 = vpack.c.bf16 %v1209_v58, %v1208_v56 }
 0x1a4   : > { %2005 = vst [vmem:[%s2522_s10 + $0x78] sm:$0xff] %v1909_v17  }
 0x1a5   : > { %2021 = vst [vmem:[%s2522_s10 + $0xf8] sm:$0xff] %v1989_v59  }
 0x1a6   : > { %2221 = shalt.err (!%p2218_p3)
}
 0x1a7   : > { %s2222_s30 = scalar_lea.hbm %s2677_s22, 4096  ;;  %s2226_s7 = scalar_lea.hbm %s2730_s4, 16384 }
 0x1a8   : > { %p2223_p4 = scmp.ne.s32.totalorder %s2677_s22, %s2222_s30  ;;  %p2227_p9 = scmp.lt.u32.totalorder %s2677_s22, %s2730_s4 }
 0x1a9   : > { %p2228_p10 = scmp.lt.u32.totalorder %s2226_s7, %s2222_s30  ;;  %p2230_p12 = scmp.lt.u32.totalorder %s2222_s30, %s2677_s22 }
 0x1aa   : > { %p2224_p7 = pnand %p2223_p4, %p2339_p5 }
 0x1ab   : > { %p2229_p11 = por %p2228_p10, %p2227_p9 }
 0x1ac   : > { %p2225_p8 = pneg %p2224_p7 }
 0x1ad   : > { %p2231_p13 = por %p2230_p12, %p2229_p11 }
 0x1af   : > { %p2232_p0 = pnand %p2231_p13, %p2225_p8 }
 0x1b1   : > { %2235 = shalt.err (!%p2232_p0)
}
 0x1b2   : > { %s2274_s9 = smov 64   ;;  %s2275_s10 = smov 4  }
 0x1b3   : > { %2054 = dma.vmem_to_hbm [thread:$0]  (%p2339_p5), %s2679_s12, 4096, %s2677_s22, %s2685_s19, %s2274_s9, %s2274_s9, %s2275_s10  }
 0x1b4 PF: > { %p2060_p1 = scmp.ge.s32.totalorder %s2270_s18, 2  ;;  %s1559_s11 = sand.u32 1, %s2258_s15  }
 0x1b5   : > { %s1560_s13 = scalar_lea.sflag [#allocation3], %s1559_s11 }
 0x1b6   : > { %p2057_p2 = pnand %p2060_p1, %p2343_p6 }
 0x1b8   : > { %2253 = dma.done.wait (!%p2057_p2), %s1560_s13, 4096  }
 0x1b9   : > { %2255 = vsyncadd (!%p2057_p2), %s1560_s13, 4294963200  ;;  %p14_p3 = scmp.ge.s32.totalorder %s2326_s21, 6   ;;  %s2733_s15 = smov %s2262_s16 }
 0x1ba   : > { %s2734_s16 = smov %s2266_s17  ;;  %s2735_s17 = smov %s2337_s24 }
 0x1bb   : > { %s2736_s18 = smov %s2326_s21  ;;  %16 = sbr.rel (!%p14_p3) target bundleno = 3 (0x3), region = 71 }
 0x1c2   :  { %1565 = vsyncpa [#allocation3], 1 }
 0x1c3   :  { %1567 = vsyncpa [#allocation3 + $0x1], 1 }

</bundles_post_ra>
